<compile_context>
chip_gen: v7x
topology: tpu7x:2x2x1
jax: 0.10.0
libtpu: 0.0.40
codegen_flags: <defaults>
</compile_context>

<pallas_src>
import jax
import jax.numpy as jnp
from jax.experimental import pallas as pl
from jax.experimental.pallas import tpu as pltpu

HIDDEN = 128
IN_F = 4
KAUG = 8          # augmented / padded contraction dim for layer 1 (4 inputs + bias + pad)
TM_CAP = 8192     # lanes per batch tile (keeps h = (128, tm) f32 at <= 4 MiB)


def policy_kernel(xa_ref, w1a_ref, w2d_ref, b2d_ref, o_ref):
    # xa:  (8, TM)    rows 0..3 = x^T, row 4 = ones (bias), rows 5..7 = zeros
    # w1a: (128, 8)   cols 0..3 = w1,  col 4 = b1,          cols 5..7 = zeros
    # w2d: (8, 128)   row 0 = w2[1]-w2[0], rest zeros (MXU-aligned padding)
    # b2d: (1, 1)     b2[1]-b2[0]
    # o:   (1, TM)    p1 = softmax(logits)[..., 1]
    # ---- Layer 1 (affine, bias folded) on the MXU; ReLU is the only VPU work ----
    h = jnp.dot(w1a_ref[...], xa_ref[...], preferred_element_type=jnp.float32)  # (128, TM)
    h = jnp.maximum(h, 0.0)
    # ---- Layer 2 logit difference on the MXU (K=128), padded to 8 output rows ----
    d = jnp.dot(w2d_ref[...], h, preferred_element_type=jnp.float32)[0:1, :]    # (1, TM)
    d = d + b2d_ref[...]
    # ---- 2-class softmax == sigmoid(d).  Clamp exp arg so the approx-reciprocal
    # Newton step never sees inf (true p1 < 1e-13 beyond the clamp; matches softmax
    # limit to well within 1e-5).
    e = jnp.exp(jnp.minimum(-d, 30.0))
    denom = 1.0 + e
    r = pl.reciprocal(denom, approx=True)   # EUP vrcp (~12-bit)
    r = r * (2.0 - denom * r)               # one Newton step -> ~f32 accuracy
    o_ref[...] = r


def _round_up(n, m):
    return ((n + m - 1) // m) * m


def _cdiv(a, b):
    return -(-a // b)


def _choose_tiling(batch):
    """Pad batch to a 128-lane multiple, then split into <=2 lane-aligned tiles
    (>=2 tiles lets v7x's two TensorCores split the 'parallel' batch axis)."""
    b128 = _round_up(max(batch, 1), 128)
    if b128 <= 128:
        n_tiles = 1
    else:
        n_tiles = max(2, _cdiv(b128, TM_CAP))
    tm = _round_up(_cdiv(b128, n_tiles), 128)
    b_pad = n_tiles * tm
    return tm, b_pad, n_tiles


def policy_forward(x, w1, b1, w2, b2):
    """x: (B, 4) f32.  w1: (128, 4), b1: (128,), w2: (2, 128), b2: (2,) (torch layout).
    Returns (B, 2) action probabilities."""
    B, F = x.shape
    assert F == IN_F and w1.shape == (HIDDEN, IN_F) and w2.shape == (2, HIDDEN)

    tm, b_pad, n_tiles = _choose_tiling(B)

    # Lane-dense layout plumbing (wrapper side).
    xa = jnp.zeros((KAUG, b_pad), jnp.float32)
    xa = xa.at[:IN_F, :B].set(x.T.astype(jnp.float32))
    xa = xa.at[IN_F, :].set(1.0)                      # bias row of ones

    w1a = jnp.zeros((HIDDEN, KAUG), jnp.float32)
    w1a = w1a.at[:, :IN_F].set(w1.astype(jnp.float32))
    w1a = w1a.at[:, IN_F].set(b1.astype(jnp.float32))

    # Logit-difference weights, padded to 8 rows so the MXU matmul is layout-aligned.
    w2d = jnp.zeros((KAUG, HIDDEN), jnp.float32).at[0, :].set(
        (w2[1, :] - w2[0, :]).astype(jnp.float32))
    b2d = (b2[1] - b2[0]).astype(jnp.float32).reshape(1, 1)

    p1_t = pl.pallas_call(
        policy_kernel,
        out_shape=jax.ShapeDtypeStruct((1, b_pad), jnp.float32),
        grid_spec=pltpu.PrefetchScalarGridSpec(
            num_scalar_prefetch=0,
            grid=(n_tiles,),
            in_specs=[
                pl.BlockSpec((KAUG, tm), lambda i: (0, i)),      # x tile (pipelined)
                pl.BlockSpec((HIDDEN, KAUG), lambda i: (0, 0)),  # w1+b1 (VMEM-resident)
                pl.BlockSpec((KAUG, HIDDEN), lambda i: (0, 0)),  # w2 diff (padded)
                pl.BlockSpec((1, 1), lambda i: (0, 0)),          # b2 diff
            ],
            out_specs=pl.BlockSpec((1, tm), lambda i: (0, i)),   # p1 row (lane-dense)
        ),
        compiler_params=pltpu.CompilerParams(
            dimension_semantics=("parallel",),
        ),
        cost_estimate=pl.CostEstimate(
            flops=b_pad * (2 * KAUG * HIDDEN + 2 * HIDDEN * KAUG + 16),
            transcendentals=2 * b_pad,
            bytes_accessed=b_pad * (KAUG * 4 + 4)
            + (HIDDEN * KAUG + KAUG * HIDDEN + 1) * 4,
        ),
    )(xa, w1a, w2d, b2d)

    # Slice away batch padding and rebuild the (B, 2) probability matrix.
    p1 = p1_t[0, :B]
    return jnp.stack([1.0 - p1, p1], axis=-1)


def init_params(key):
    # Deterministic synthetic init, torch nn.Linear layout ([out, in]) and rough scale.
    k1, k2, k3, k4 = jax.random.split(key, 4)
    w1 = jax.random.uniform(k1, (HIDDEN, IN_F), jnp.float32, -0.5, 0.5)
    b1 = jax.random.uniform(k2, (HIDDEN,), jnp.float32, -0.5, 0.5)
    w2 = jax.random.uniform(k3, (2, HIDDEN), jnp.float32, -0.0884, 0.0884)
    b2 = jax.random.uniform(k4, (2,), jnp.float32, -0.0884, 0.0884)
    return w1, b1, w2, b2


def reference_forward(x, w1, b1, w2, b2):
    h = jnp.maximum(x @ w1.T + b1, 0.0)
    logits = h @ w2.T + b2
    return jax.nn.softmax(logits, axis=-1)


if __name__ == "__main__":
    key = jax.random.PRNGKey(0)
    kx, kp, kb, kc = jax.random.split(key, 4)
    w1, b1, w2, b2 = init_params(kp)

    # Small case (module-sized): batch of 2 CartPole-style 4-dim observations.
    B = 2
    x = jax.random.normal(kx, (B, IN_F), jnp.float32)
    out = jax.block_until_ready(policy_forward(x, w1, b1, w2, b2))
    ref = reference_forward(x, w1, b1, w2, b2)
    assert out.shape == (B, 2)
    assert jnp.allclose(out, ref, atol=1e-5), "mismatch vs JAX reference (B=2)"
    assert jnp.allclose(jnp.sum(out, axis=-1), 1.0, atol=1e-5), "probs must sum to 1"

    # Larger batch exercises the 2-tile pipelined grid path.
    B2 = 4096
    x2 = jax.random.normal(kb, (B2, IN_F), jnp.float32)
    out2 = jax.block_until_ready(policy_forward(x2, w1, b1, w2, b2))
    ref2 = reference_forward(x2, w1, b1, w2, b2)
    assert out2.shape == (B2, 2)
    assert jnp.allclose(out2, ref2, atol=1e-5), "mismatch vs JAX reference (B=4096)"

    # Awkward batch size exercises the decoupled-padding path (no ~2x pad blowup).
    B3 = 1025
    x3 = jax.random.normal(kc, (B3, IN_F), jnp.float32)
    out3 = jax.block_until_ready(policy_forward(x3, w1, b1, w2, b2))
    ref3 = reference_forward(x3, w1, b1, w2, b2)
    assert out3.shape == (B3, 2)
    assert jnp.allclose(out3, ref3, atol=1e-5), "mismatch vs JAX reference (B=1025)"

    print("KERNEL_OK")
</pallas_src>

<mosaic_0001>
module attributes {stable_mosaic.version = 11 : i64} {
  func.func @policy_kernel(%arg0: i32, %arg1: memref<8x128xf32, #tpu.memory_space<vmem>>, %arg2: memref<128x8xf32, #tpu.memory_space<vmem>>, %arg3: memref<8x128xf32, #tpu.memory_space<vmem>>, %arg4: memref<1x1xf32, #tpu.memory_space<vmem>>, %arg5: memref<1x128xf32, #tpu.memory_space<vmem>>) attributes {dimension_semantics = [#tpu.dimension_semantics<parallel>], iteration_bounds = array<i64: 1>, scalar_prefetch = 0 : i64, scratch_operands = 0 : i64, tpu.core_type = #tpu.core_type<tc>, window_params = [{transform_indices = @transform_0, window_bounds = array<i64: 8, 128>}, {pipeline_mode = #tpu.pipeline_mode<synchronous>, transform_indices = @transform_1, window_bounds = array<i64: 128, 8>}, {pipeline_mode = #tpu.pipeline_mode<synchronous>, transform_indices = @transform_2, window_bounds = array<i64: 8, 128>}, {pipeline_mode = #tpu.pipeline_mode<synchronous>, transform_indices = @transform_3, window_bounds = array<i64: 1, 1>}, {transform_indices = @transform_4, window_bounds = array<i64: 1, 128>}]} {
    %c0 = arith.constant 0 : index
    %c0_0 = arith.constant 0 : index
    %0 = vector.load %arg2[%c0, %c0_0] : memref<128x8xf32, #tpu.memory_space<vmem>>, vector<128x8xf32>
    %c0_1 = arith.constant 0 : index
    %c0_2 = arith.constant 0 : index
    %1 = vector.load %arg1[%c0_1, %c0_2] : memref<8x128xf32, #tpu.memory_space<vmem>>, vector<8x128xf32>
    %cst = arith.constant dense<0.000000e+00> : vector<128x128xf32>
    %2 = tpu.matmul %0, %1, %cst {dimension_numbers = #tpu.dot_dimension_numbers<[1], [0], [0], [1], [0, 0, 1, 1], [], []>} : vector<128x8xf32>, vector<8x128xf32>, vector<128x128xf32> -> vector<128x128xf32>
    %cst_3 = arith.constant 0.000000e+00 : f32
    %3 = vector.broadcast %cst_3 : f32 to vector<128x128xf32>
    %4 = arith.maximumf %2, %3 : vector<128x128xf32>
    %c0_4 = arith.constant 0 : index
    %c0_5 = arith.constant 0 : index
    %5 = vector.load %arg3[%c0_4, %c0_5] : memref<8x128xf32, #tpu.memory_space<vmem>>, vector<8x128xf32>
    %cst_6 = arith.constant dense<0.000000e+00> : vector<8x128xf32>
    %6 = tpu.matmul %5, %4, %cst_6 {dimension_numbers = #tpu.dot_dimension_numbers<[1], [0], [0], [1], [0, 0, 1, 1], [], []>} : vector<8x128xf32>, vector<128x128xf32>, vector<8x128xf32> -> vector<8x128xf32>
    %7 = vector.extract_strided_slice %6 {offsets = [0, 0], sizes = [1, 128], strides = [1, 1]} : vector<8x128xf32> to vector<1x128xf32>
    %c0_7 = arith.constant 0 : index
    %c0_8 = arith.constant 0 : index
    %8 = vector.load %arg4[%c0_7, %c0_8] : memref<1x1xf32, #tpu.memory_space<vmem>>, vector<1x1xf32>
    %9 = vector.broadcast %8 : vector<1x1xf32> to vector<1x128xf32>
    %10 = arith.addf %7, %9 : vector<1x128xf32>
    %cst_9 = arith.constant 0.000000e+00 : f32
    %11 = vector.broadcast %cst_9 : f32 to vector<1x128xf32>
    %12 = arith.subf %11, %10 : vector<1x128xf32>
    %cst_10 = arith.constant 3.000000e+01 : f32
    %13 = vector.broadcast %cst_10 : f32 to vector<1x128xf32>
    %14 = arith.minimumf %12, %13 : vector<1x128xf32>
    %15 = math.exp %14 : vector<1x128xf32>
    %cst_11 = arith.constant 1.000000e+00 : f32
    %16 = vector.broadcast %cst_11 : f32 to vector<1x128xf32>
    %17 = arith.addf %16, %15 : vector<1x128xf32>
    %18 = tpu.reciprocal %17 {approx = true} : vector<1x128xf32> -> vector<1x128xf32>
    %19 = arith.mulf %17, %18 : vector<1x128xf32>
    %cst_12 = arith.constant 2.000000e+00 : f32
    %20 = vector.broadcast %cst_12 : f32 to vector<1x128xf32>
    %21 = arith.subf %20, %19 : vector<1x128xf32>
    %22 = arith.mulf %18, %21 : vector<1x128xf32>
    %c0_13 = arith.constant 0 : index
    %c0_14 = arith.constant 0 : index
    %23 = vector.load %arg5[%c0_13, %c0_14] : memref<1x128xf32, #tpu.memory_space<vmem>>, vector<1x128xf32>
    tpu.vector_store %arg5[%c0_13, %c0_14], %22 {strides = array<i32>} : memref<1x128xf32, #tpu.memory_space<vmem>>, vector<1x128xf32>,
    return
  }
  func.func @transform_0(%arg0: i32) -> (i32, i32) {
    %c0_i32 = arith.constant 0 : i32
    %c0_i32_0 = arith.constant 0 : i32
    return %c0_i32, %arg0 : i32, i32
  }
  func.func @transform_1(%arg0: i32) -> (i32, i32) {
    %c0_i32 = arith.constant 0 : i32
    %c0_i32_0 = arith.constant 0 : i32
    %c0_i32_1 = arith.constant 0 : i32
    return %c0_i32, %c0_i32_0 : i32, i32
  }
  func.func @transform_2(%arg0: i32) -> (i32, i32) {
    %c0_i32 = arith.constant 0 : i32
    %c0_i32_0 = arith.constant 0 : i32
    %c0_i32_1 = arith.constant 0 : i32
    return %c0_i32, %c0_i32_0 : i32, i32
  }
  func.func @transform_3(%arg0: i32) -> (i32, i32) {
    %c0_i32 = arith.constant 0 : i32
    %c0_i32_0 = arith.constant 0 : i32
    %c0_i32_1 = arith.constant 0 : i32
    return %c0_i32, %c0_i32_0 : i32, i32
  }
  func.func @transform_4(%arg0: i32) -> (i32, i32) {
    %c0_i32 = arith.constant 0 : i32
    %c0_i32_0 = arith.constant 0 : i32
    return %c0_i32, %arg0 : i32, i32
  }
}

</mosaic_0001>

<bundles_post_ra>
// kernel: tpu_custom_call.1
= control target key start
LH: loop header
LB: loop body
LE: loop exit
PB: predicated region body
PF: predicated region fallthrough
CT: control target
= control target key end

     0   :  { %s637_s0 = inlined_call_operand.vmem [shape: f32[8,128], index: 0, kind: input, shape index: {}]   ;;  %s638_s1 = inlined_call_operand.vmem [shape: f32[128,8], index: 1, kind: input, shape index: {}]   ;;  %s639_s2 = inlined_call_operand.vmem [shape: f32[8,128], index: 2, kind: input, shape index: {}]   ;;  %s640_s3 = inlined_call_operand.<no memory space> [shape: f32[1,1], index: 3, kind: input, shape index: {}]   ;;  %s641_s4 = inlined_call_operand.hbm [shape: f32[1,128], index: 4, kind: output, shape index: {}]  }
   0x1   :  { %v9_v0 = vstv %s640_s3 }
   0x2   :  { %10 = vst [vmem:[#allocation2] sm:$0x1] %v9_v0 }
   0x3   :  { %v36_v1 = vld [vmem:[%s637_s0] sm:$0xff]  ;;  %vm37_vm0 = vcmask 64512   ;;  %v21_v3 = vld [vmem:[%s638_s1 + $0x8] sm:$0xff]  ;;  %v22_v4 = vld [vmem:[%s638_s1 + $0x10] sm:$0xff] }
   0x4   :  { %v20_v2 = vld [vmem:[%s638_s1] sm:$0xff]  ;;  %403 = vmatprep.subr.mxu0 %v36_v1  ;;  %v23_v5 = vld [vmem:[%s638_s1 + $0x18] sm:$0xff] }
   0x5   :  { %405 = vmatprep.mubr.msk.f32.mxu0 %vm37_vm0, %v20_v2  ;;  %404 = vmatpush3.msra.mxu0 %v36_v1  ;;  %v24_v6 = vld [vmem:[%s638_s1 + $0x20] sm:$0xff] }
   0x6   :  { %406 = vmatmul.mubr.msk.f32.vlgmr.msra.gmra.mrb[0].mxu0 %vm37_vm0, %v21_v3 }
   0x7   :  { %408 = vmatprep.mubr.msk.f32.mxu0 %vm37_vm0, %v22_v4 }
   0x8   :  { %11 = vsyncpa [#allocation4], 0  ;;  %v25_v7 = vld [vmem:[%s638_s1 + $0x28] sm:$0xff]  ;;  %v26_v8 = vld [vmem:[%s638_s1 + $0x30] sm:$0xff]  ;;  %v522_v18 = vmov 0.0|0.0   ;;  %vm523_vm1 = vmmov 0   ;;  %v324_v63 = vlaneseq }
   0x9   :  { %v27_v9 = vld [vmem:[%s638_s1 + $0x38] sm:$0xff]  ;;  %v28_v10 = vld [vmem:[%s638_s1 + $0x40] sm:$0xff]  ;;  %v29_v11 = vld [vmem:[%s638_s1 + $0x48] sm:$0xff]  ;;  %464 = vmatprep.subr.bf16.mxu1 %v522_v18  ;;  %v524_v19 = vmov 0.0   ;;  %v525_v21 = vmov 0   ;;  %s526_s24 = smov [#allocation3]  }
   0xa   :  { %409 = vmatmul.mubr.msk.f32.gmra.mrb[2].mxu0 %vm37_vm0, %v23_v5  ;;  %v30_v12 = vld [vmem:[%s638_s1 + $0x50] sm:$0xff]  ;;  %v31_v13 = vld [vmem:[%s638_s1 + $0x58] sm:$0xff]  ;;  %v32_v14 = vld [vmem:[%s638_s1 + $0x60] sm:$0xff]  ;;  %461 = vmatprep.mubr.msk.f32.mxu1 %vm523_vm1, %v524_v19  ;;  %v325_v0 = vshrl.u32 %v324_v63, 7 }
   0xb   :  { %411 = vmatprep.mubr.msk.f32.mxu0 %vm37_vm0, %v24_v6  ;;  %v33_v15 = vld [vmem:[%s638_s1 + $0x68] sm:$0xff]  ;;  %v34_v16 = vld [vmem:[%s638_s1 + $0x70] sm:$0xff]  ;;  %v35_v17 = vld [vmem:[%s638_s1 + $0x78] sm:$0xff]  ;;  %493 = vset.pattern.permute.xlu0 %v525_v21 }
   0xc   :  { %v318_v20 = vld [vmem:[#allocation2] sm:$0x1]  ;;  %v326_v1 = vsub.s32 0, %v325_v0 }
   0xd   :  { %321 = vperm.xlu0 %493, %v318_v20   ;;  %v247_v62 = vld [vmem:[%s639_s2] sm:$0xff]  ;;  %s345_s2 = sshll.u32 %s526_s24, 4  ;;  %s346_s2 = int_to_ptr.vmem [resolvable:$true] %s345_s2 }
   0xe   :  { %412 = vmatmul.mubr.msk.f32.gmra.mrb[4].mxu0 %vm37_vm0, %v25_v7  ;;  %s498_s0 = scalar_lea.vmem %s346_s2, 16  ;;  %s502_s3 = scalar_lea.vmem %s346_s2, 32 }
   0xf   :  { %414 = vmatprep.mubr.msk.f32.mxu0 %vm37_vm0, %v26_v8  ;;  %p499_p0 = scmp.ne.s32.totalorder %s346_s2, %s498_s0  ;;  %p503_p1 = scmp.lt.s32.totalorder %s346_s2, %s346_s2 }
  0x10   :  { %p504_p2 = scmp.lt.s32.totalorder %s502_s3, %s498_s0 }
  0x12   :  { %415 = vmatmul.mubr.msk.f32.gmra.mrb[6].mxu0 %vm37_vm0, %v27_v9  ;;  %p505_p3 = por %p504_p2, %p503_p1 }
  0x13   :  { %417 = vmatprep.mubr.msk.f32.mxu0 %vm37_vm0, %v28_v10 }
  0x14   :  { %p506_p4 = pnand %p505_p3, %p499_p0 }
  0x16   :  { %418 = vmatmul.mubr.msk.f32.gmra.mrb[8].mxu0 %vm37_vm0, %v29_v11 }
  0x17   :  { %420 = vmatprep.mubr.msk.f32.mxu0 %vm37_vm0, %v30_v12 }
  0x1a   :  { %421 = vmatmul.mubr.msk.f32.gmra.mrb[10].mxu0 %vm37_vm0, %v31_v13 }
  0x1b   :  { %423 = vmatprep.mubr.msk.f32.mxu0 %vm37_vm0, %v32_v14 }
  0x1e   :  { %424 = vmatmul.mubr.msk.f32.gmra.mrb[12].mxu0 %vm37_vm0, %v33_v15 }
  0x1f   :  { %426 = vmatprep.mubr.msk.f32.mxu0 %vm37_vm0, %v34_v16 }
  0x22   :  { %427 = vmatmul.mubr.msk.f32.gmra.mrb[14].mxu0 %vm37_vm0, %v35_v17 }
  0x8c   :  { %v322_v2 = vpop.permute.xlu0 %321 }
  0x8d   :  { %v327_v3 = vrot.slane %v322_v2, %v326_v1 }
  0xd9   :  { %v407_v22 = vpop.f32.mrb[0].mxu0 }
  0xda   :  { %v232_v23 = vmax.f32 %v407_v22, 0.0  ;;  %v152_v24 = vpop.f32.mrb[1].mxu0 }
  0xdb   :  { %v231_v25 = vmax.f32 %v152_v24, 0.0 }
  0xdd   :  { %v410_v26 = vpop.f32.mrb[2].mxu0  ;;  %v465_v27 = vpack.c.bf16 %v232_v23, %v231_v25 }
  0xde   :  { %v234_v28 = vmax.f32 %v410_v26, 0.0  ;;  %v162_v29 = vpop.f32.mrb[3].mxu0 }
  0xdf   :  { %v233_v30 = vmax.f32 %v162_v29, 0.0  ;;  %466 = vmatpush3.bf16.msra.mxu1 %v465_v27 }
  0xe0   :  { %467 = vmatprep.subr.bf16.mxu1 %v522_v18 }
  0xe1   :  { %v468_v31 = vpack.c.bf16 %v234_v28, %v233_v30  ;;  %v413_v32 = vpop.f32.mrb[4].mxu0 }
  0xe2   :  { %v236_v33 = vmax.f32 %v413_v32, 0.0  ;;  %v172_v34 = vpop.f32.mrb[5].mxu0 }
  0xe3   :  { %v235_v35 = vmax.f32 %v172_v34, 0.0  ;;  %469 = vmatpush3.bf16.msra.mxu1 %v468_v31 }
  0xe4   :  { %470 = vmatprep.subr.bf16.mxu1 %v522_v18 }
  0xe5   :  { %v471_v36 = vpack.c.bf16 %v236_v33, %v235_v35  ;;  %v416_v37 = vpop.f32.mrb[6].mxu0 }
  0xe6   :  { %v238_v38 = vmax.f32 %v416_v37, 0.0  ;;  %v182_v39 = vpop.f32.mrb[7].mxu0 }
  0xe7   :  { %v237_v40 = vmax.f32 %v182_v39, 0.0  ;;  %472 = vmatpush3.bf16.msra.mxu1 %v471_v36 }
  0xe8   :  { %473 = vmatprep.subr.bf16.mxu1 %v522_v18 }
  0xe9   :  { %v474_v41 = vpack.c.bf16 %v238_v38, %v237_v40  ;;  %v419_v42 = vpop.f32.mrb[8].mxu0 }
  0xea   :  { %v240_v43 = vmax.f32 %v419_v42, 0.0  ;;  %v192_v44 = vpop.f32.mrb[9].mxu0 }
  0xeb   :  { %v239_v45 = vmax.f32 %v192_v44, 0.0  ;;  %475 = vmatpush3.bf16.msra.mxu1 %v474_v41 }
  0xec   :  { %476 = vmatprep.subr.bf16.mxu1 %v522_v18 }
  0xed   :  { %v477_v46 = vpack.c.bf16 %v240_v43, %v239_v45  ;;  %v422_v47 = vpop.f32.mrb[10].mxu0 }
  0xee   :  { %v242_v48 = vmax.f32 %v422_v47, 0.0  ;;  %v202_v49 = vpop.f32.mrb[11].mxu0 }
  0xef   :  { %v241_v50 = vmax.f32 %v202_v49, 0.0  ;;  %478 = vmatpush3.bf16.msra.mxu1 %v477_v46 }
  0xf0   :  { %479 = vmatprep.subr.bf16.mxu1 %v522_v18 }
  0xf1   :  { %v480_v51 = vpack.c.bf16 %v242_v48, %v241_v50  ;;  %v425_v52 = vpop.f32.mrb[12].mxu0 }
  0xf2   :  { %v244_v53 = vmax.f32 %v425_v52, 0.0  ;;  %v212_v54 = vpop.f32.mrb[13].mxu0 }
  0xf3   :  { %v243_v55 = vmax.f32 %v212_v54, 0.0  ;;  %481 = vmatpush3.bf16.msra.mxu1 %v480_v51 }
  0xf4   :  { %482 = vmatprep.subr.bf16.mxu1 %v522_v18 }
  0xf5   :  { %v483_v56 = vpack.c.bf16 %v244_v53, %v243_v55  ;;  %v428_v57 = vpop.f32.mrb[14].mxu0 }
  0xf6   :  { %v246_v58 = vmax.f32 %v428_v57, 0.0  ;;  %v222_v59 = vpop.f32.mrb[15].mxu0 }
  0xf7   :  { %v245_v60 = vmax.f32 %v222_v59, 0.0  ;;  %484 = vmatpush3.bf16.msra.mxu1 %v483_v56 }
  0xf8   :  { %485 = vmatprep.subr.bf16.mxu1 %v522_v18 }
  0xf9   :  { %v486_v61 = vpack.c.bf16 %v246_v58, %v245_v60 }
  0xfb   :  { %487 = vmatpush3.bf16.msra.mxu1 %v486_v61 }
  0xfe   :  { %462 = vmatmul.mubr.f32.vlgmr.msra.gmra.mrb[0].mxu1 %v247_v62 }
 0x1d1   :  { %v314_v4 = vpop.f32.mrb[0].mxu1 }
 0x1d2   :  { %v328_v5 = vadd.f32 %v327_v3, %v314_v4  ;;  %v463_v6 = vpop.f32.mrb[1].mxu1 }
 0x1d4   :  { %v329_v7 = vsub.f32 0.0, %v328_v5 }
 0x1d6   :  { %v330_v8 = vmin.f32 %v329_v7, 30.0 }
 0x1d8   :  { %v331_v9 = vmul.f32 1.442695, %v330_v8 }
 0x1da   :  { %494 = vpow2.f32 %v331_v9 }
 0x1e4   :  { %v495_v10 = vpop.eup %494 }
 0x1e5   :  { %v333_v11 = vadd.f32 1.0, %v495_v10 }
 0x1e7   :  { %496 = vrcp.f32 %v333_v11 }
 0x1f1   :  { %v497_v12 = vpop.eup %496 }
 0x1f2   :  { %v335_v13 = vmul.f32 %v497_v12, %v333_v11 }
 0x1f4   :  { %v336_v14 = vsub.f32 2.0, %v335_v13 }
 0x1f6   :  { %v337_v15 = vmul.f32 %v497_v12, %v336_v14 }
 0x1f8   :  { %338 = vst [vmem:[#allocation3] sm:$0x1] %v337_v15 }
 0x1f9   :  { %509 = shalt.err (!%p506_p4)
}
 0x1fa   :  { %s510_s27 = scalar_lea.hbm %s641_s4, 16 }
 0x1fb   :  { %p511_p5 = scmp.ne.s32.totalorder %s641_s4, %s510_s27  ;;  %p514_p6 = scmp.lt.u32.totalorder %s510_s27, %s641_s4 }
 0x1fd   :  { %p516_p7 = pnand %p514_p6, %p511_p5 }
 0x1ff   :  { %519 = shalt.err (!%p516_p7)
}
 0x200   :  { %348 = dma.vmem_to_hbm [thread:$0]  %s346_s2, 16, %s641_s4, [#allocation4]  }
 0x201   :  { %520 = dma.done.wait [#allocation4], 16  }
 0x202   :  { %521 = vsyncadd [#allocation4], 4294967280 }
 0x203   :  { %352 = vsyncpa [#allocation4], 1 }

</bundles_post_ra>
